<compile_context>
chip_gen: v7x
topology: tpu7x:2x2x1
jax: 0.10.0
libtpu: 0.0.40
codegen_flags: <defaults>
</compile_context>

<pallas_src>
import jax
import jax.numpy as jnp
from jax.experimental import pallas as pl
from jax.experimental.pallas import tpu as pltpu


def _han_kernel(x_ref, w_ref, b_ref, u_ref, o_ref):
    # x_ref: (ND, K, L)  news embeddings for ND days
    # w_ref: (ND, L, L)  per-day projection weights
    # b_ref: (ND, 1, L)  per-day projection bias
    # u_ref: (ND, 1, L)  per-day attention context vector
    # o_ref: (ND, 1, L)  attention-pooled day embeddings
    x = x_ref[...]
    w = w_ref[...]
    b = b_ref[...]
    u = u_ref[...]

    # Per-day projection on the MXU (batched matmul, f32 accumulation).
    proj = jnp.einsum("nkl,nlm->nkm", x, w,
                      preferred_element_type=jnp.float32)            # (ND, K, L)
    h = jnp.tanh(proj + b.astype(jnp.float32))                       # (ND, K, L)

    # Attention scores on the MXU, lane-dense over K: (ND,1,L)x(ND,K,L)->(ND,1,K)
    s = jnp.einsum("nal,nkl->nak", u.astype(jnp.float32), h,
                   preferred_element_type=jnp.float32)               # (ND, 1, K)

    # Softmax over the K news items (lane axis), EUP reciprocal for the norm.
    m = jnp.max(s, axis=-1, keepdims=True)                           # (ND, 1, 1)
    e = jnp.exp(s - m)                                               # (ND, 1, K)
    denom = jnp.sum(e, axis=-1, keepdims=True)                       # (ND, 1, 1)
    alpha = e * pl.reciprocal(denom, approx=True)                    # (ND, 1, K)

    # Weighted sum of the original news embeddings on the MXU.
    day = jnp.einsum("nak,nkl->nal", alpha.astype(x.dtype), x,
                     preferred_element_type=jnp.float32)             # (ND, 1, L)
    o_ref[...] = day.astype(o_ref.dtype)


def han_forward(data, w, b, u, *, days_per_block=8, compute_dtype=None):
    """data: (N, K, L); w: (N, L, L); b: (N, L); u: (N, L) -> (N, L).

    days_per_block: days processed per grid step (amortizes per-step overhead).
    compute_dtype:  e.g. jnp.bfloat16 on v6e/v7x for MXU throughput / HBM BW;
                    accumulation and softmax stay in f32.
    """
    N, K, L = data.shape
    out_dtype = data.dtype

    if compute_dtype is not None:
        data = data.astype(compute_dtype)
        w = w.astype(compute_dtype)
        b = b.astype(compute_dtype)
        u = u.astype(compute_dtype)

    nd = max(1, min(days_per_block, N))
    pad = (-N) % nd
    if pad:
        # Zero-padded days are numerically safe (uniform softmax over zeros).
        data = jnp.pad(data, ((0, pad), (0, 0), (0, 0)))
        w = jnp.pad(w, ((0, pad), (0, 0), (0, 0)))
        b = jnp.pad(b, ((0, pad), (0, 0)))
        u = jnp.pad(u, ((0, pad), (0, 0)))
    n_pad = N + pad

    # Present b/u as (N, 1, L) so the kernel only does a sublane broadcast /
    # batched matmuls (no in-kernel expand_dims).
    b3 = b.reshape(n_pad, 1, L)
    u3 = u.reshape(n_pad, 1, L)

    out = pl.pallas_call(
        _han_kernel,
        out_shape=jax.ShapeDtypeStruct((n_pad, 1, L), out_dtype),
        grid_spec=pltpu.PrefetchScalarGridSpec(
            num_scalar_prefetch=0,
            grid=(n_pad // nd,),   # one step per block of ND days
            in_specs=[
                pl.BlockSpec((nd, K, L), lambda i: (i, 0, 0)),
                pl.BlockSpec((nd, L, L), lambda i: (i, 0, 0)),
                pl.BlockSpec((nd, 1, L), lambda i: (i, 0, 0)),
                pl.BlockSpec((nd, 1, L), lambda i: (i, 0, 0)),
            ],
            out_specs=pl.BlockSpec((nd, 1, L), lambda i: (i, 0, 0)),
        ),
        compiler_params=pltpu.CompilerParams(
            dimension_semantics=("parallel",),
        ),
    )(data, w, b3, u3)

    return out.reshape(n_pad, L)[:N]


def han_reference(data, w, b, u):
    """Pure-JAX reference of the same per-day attention pooling."""
    h = jnp.tanh(jnp.einsum("nkl,nlm->nkm", data, w) + b[:, None, :])
    scores = jnp.sum(h * u[:, None, :], axis=-1)              # (N, K)
    alpha = jax.nn.softmax(scores, axis=-1)                   # (N, K)
    return jnp.einsum("nk,nkl->nl", alpha, data)              # (N, L)


if __name__ == "__main__":
    # Small, forward-consistent shapes: N=16 days, K=8 news/day, L=32 dims.
    N, K, L = 16, 8, 32
    key = jax.random.PRNGKey(0)
    k_data, k_w, k_b, k_u = jax.random.split(key, 4)

    data = jax.random.normal(k_data, (N, K, L), dtype=jnp.float32)
    # One NewsAttention(L) parameter set per day, stacked along axis 0.
    w = jax.random.normal(k_w, (N, L, L), dtype=jnp.float32) * (1.0 / float(L) ** 0.5)
    b = jax.random.normal(k_b, (N, L), dtype=jnp.float32) * 0.01
    u = jax.random.normal(k_u, (N, L), dtype=jnp.float32) * (1.0 / float(L) ** 0.5)

    ref = han_reference(data, w, b, u)

    # f32 path (v5e-style: f32 elementwise math, f32 MXU inputs).
    out = jax.block_until_ready(han_forward(data, w, b, u))
    assert out.shape == (N, L)
    assert jnp.allclose(out, ref, atol=2e-3, rtol=2e-3), float(
        jnp.max(jnp.abs(out - ref)))

    # bf16-input path (v6e/v7x MXU/HBM win); f32 accumulation inside the kernel.
    out_bf16 = jax.block_until_ready(
        han_forward(data, w, b, u, compute_dtype=jnp.bfloat16))
    assert jnp.allclose(out_bf16, ref, atol=5e-2, rtol=5e-2)

    print("KERNEL_OK")
</pallas_src>

<mosaic_0001>
module attributes {stable_mosaic.version = 11 : i64} {
  func.func @_han_kernel(%arg0: i32, %arg1: memref<8x8x32xf32, #tpu.memory_space<vmem>>, %arg2: memref<8x32x32xf32, #tpu.memory_space<vmem>>, %arg3: memref<8x1x32xf32, #tpu.memory_space<vmem>>, %arg4: memref<8x1x32xf32, #tpu.memory_space<vmem>>, %arg5: memref<8x1x32xf32, #tpu.memory_space<vmem>>) attributes {dimension_semantics = [#tpu.dimension_semantics<parallel>], iteration_bounds = array<i64: 2>, scalar_prefetch = 0 : i64, scratch_operands = 0 : i64, tpu.core_type = #tpu.core_type<tc>, window_params = [{transform_indices = @transform_0, window_bounds = array<i64: 8, 8, 32>}, {transform_indices = @transform_1, window_bounds = array<i64: 8, 32, 32>}, {transform_indices = @transform_2, window_bounds = array<i64: 8, 1, 32>}, {transform_indices = @transform_3, window_bounds = array<i64: 8, 1, 32>}, {transform_indices = @transform_4, window_bounds = array<i64: 8, 1, 32>}]} {
    %c0 = arith.constant 0 : index
    %c0_0 = arith.constant 0 : index
    %c0_1 = arith.constant 0 : index
    %0 = vector.load %arg1[%c0, %c0_0, %c0_1] : memref<8x8x32xf32, #tpu.memory_space<vmem>>, vector<8x8x32xf32>
    %c0_2 = arith.constant 0 : index
    %c0_3 = arith.constant 0 : index
    %c0_4 = arith.constant 0 : index
    %1 = vector.load %arg2[%c0_2, %c0_3, %c0_4] : memref<8x32x32xf32, #tpu.memory_space<vmem>>, vector<8x32x32xf32>
    %c0_5 = arith.constant 0 : index
    %c0_6 = arith.constant 0 : index
    %c0_7 = arith.constant 0 : index
    %2 = vector.load %arg3[%c0_5, %c0_6, %c0_7] : memref<8x1x32xf32, #tpu.memory_space<vmem>>, vector<8x1x32xf32>
    %c0_8 = arith.constant 0 : index
    %c0_9 = arith.constant 0 : index
    %c0_10 = arith.constant 0 : index
    %3 = vector.load %arg4[%c0_8, %c0_9, %c0_10] : memref<8x1x32xf32, #tpu.memory_space<vmem>>, vector<8x1x32xf32>
    "tpu.trace_start"() <{level = 10 : i32, message = "nkl,nlm->nkm"}> : () -> ()
    %cst = arith.constant dense<0.000000e+00> : vector<8x8x32xf32>
    %4 = tpu.matmul %0, %1, %cst {dimension_numbers = #tpu.dot_dimension_numbers<[2], [1], [1], [2], [0, 0, 0, 1, 1, 2], [0], [0]>} : vector<8x8x32xf32>, vector<8x32x32xf32>, vector<8x8x32xf32> -> vector<8x8x32xf32>
    "tpu.trace_stop"() : () -> ()
    %5 = vector.broadcast %2 : vector<8x1x32xf32> to vector<8x8x32xf32>
    %6 = arith.addf %4, %5 : vector<8x8x32xf32>
    %7 = math.tanh %6 : vector<8x8x32xf32>
    "tpu.trace_start"() <{level = 10 : i32, message = "nal,nkl->nak"}> : () -> ()
    %cst_11 = arith.constant dense<0.000000e+00> : vector<8x1x8xf32>
    %8 = tpu.matmul %3, %7, %cst_11 {dimension_numbers = #tpu.dot_dimension_numbers<[2], [2], [1], [1], [0, 0, 0, 1, 1, 1], [0], [0]>} : vector<8x1x32xf32>, vector<8x8x32xf32>, vector<8x1x8xf32> -> vector<8x1x8xf32>
    "tpu.trace_stop"() : () -> ()
    %cst_12 = arith.constant dense<0xFF800000> : vector<8x1xf32>
    %9 = vector.multi_reduction <maximumf>, %8, %cst_12 [2] : vector<8x1x8xf32> to vector<8x1xf32>
    %10 = vector.shape_cast %9 : vector<8x1xf32> to vector<8x1x1xf32>
    %11 = vector.broadcast %10 : vector<8x1x1xf32> to vector<8x1x8xf32>
    %12 = arith.subf %8, %11 : vector<8x1x8xf32>
    %13 = math.exp %12 : vector<8x1x8xf32>
    %cst_13 = arith.constant dense<0.000000e+00> : vector<8x1xf32>
    %14 = vector.multi_reduction <add>, %13, %cst_13 [2] : vector<8x1x8xf32> to vector<8x1xf32>
    %15 = vector.shape_cast %14 : vector<8x1xf32> to vector<8x1x1xf32>
    %16 = tpu.reciprocal %15 {approx = true} : vector<8x1x1xf32> -> vector<8x1x1xf32>
    %17 = vector.broadcast %16 : vector<8x1x1xf32> to vector<8x1x8xf32>
    %18 = arith.mulf %13, %17 : vector<8x1x8xf32>
    "tpu.trace_start"() <{level = 10 : i32, message = "nak,nkl->nal"}> : () -> ()
    %cst_14 = arith.constant dense<0.000000e+00> : vector<8x1x32xf32>
    %19 = tpu.matmul %18, %0, %cst_14 {dimension_numbers = #tpu.dot_dimension_numbers<[2], [1], [1], [2], [0, 0, 0, 1, 1, 2], [0], [0]>} : vector<8x1x8xf32>, vector<8x8x32xf32>, vector<8x1x32xf32> -> vector<8x1x32xf32>
    "tpu.trace_stop"() : () -> ()
    %c0_15 = arith.constant 0 : index
    %c0_16 = arith.constant 0 : index
    %c0_17 = arith.constant 0 : index
    %20 = vector.load %arg5[%c0_15, %c0_16, %c0_17] : memref<8x1x32xf32, #tpu.memory_space<vmem>>, vector<8x1x32xf32>
    tpu.vector_store %arg5[%c0_15, %c0_16, %c0_17], %19 {strides = array<i32>} : memref<8x1x32xf32, #tpu.memory_space<vmem>>, vector<8x1x32xf32>,
    return
  }
  func.func @transform_0(%arg0: i32) -> (i32, i32, i32) {
    %c0_i32 = arith.constant 0 : i32
    %c0_i32_0 = arith.constant 0 : i32
    %c0_i32_1 = arith.constant 0 : i32
    return %arg0, %c0_i32, %c0_i32_0 : i32, i32, i32
  }
  func.func @transform_1(%arg0: i32) -> (i32, i32, i32) {
    %c0_i32 = arith.constant 0 : i32
    %c0_i32_0 = arith.constant 0 : i32
    %c0_i32_1 = arith.constant 0 : i32
    return %arg0, %c0_i32, %c0_i32_0 : i32, i32, i32
  }
  func.func @transform_2(%arg0: i32) -> (i32, i32, i32) {
    %c0_i32 = arith.constant 0 : i32
    %c0_i32_0 = arith.constant 0 : i32
    %c0_i32_1 = arith.constant 0 : i32
    return %arg0, %c0_i32, %c0_i32_0 : i32, i32, i32
  }
  func.func @transform_3(%arg0: i32) -> (i32, i32, i32) {
    %c0_i32 = arith.constant 0 : i32
    %c0_i32_0 = arith.constant 0 : i32
    %c0_i32_1 = arith.constant 0 : i32
    return %arg0, %c0_i32, %c0_i32_0 : i32, i32, i32
  }
  func.func @transform_4(%arg0: i32) -> (i32, i32, i32) {
    %c0_i32 = arith.constant 0 : i32
    %c0_i32_0 = arith.constant 0 : i32
    %c0_i32_1 = arith.constant 0 : i32
    return %arg0, %c0_i32, %c0_i32_0 : i32, i32, i32
  }
}

</mosaic_0001>

<bundles_post_ra>
// kernel: tpu_custom_call.1
= control target key start
LH: loop header
LB: loop body
LE: loop exit
PB: predicated region body
PF: predicated region fallthrough
CT: control target
= control target key end

     0   :  { %s3728_s0 = inlined_call_operand.hbm [shape: f32[16,8,32], index: 0, kind: input, shape index: {}]   ;;  %s3729_s1 = inlined_call_operand.hbm [shape: f32[16,32,32], index: 1, kind: input, shape index: {}]   ;;  %s3730_s2 = inlined_call_operand.hbm [shape: f32[16,1,32], index: 2, kind: input, shape index: {}]   ;;  %s3731_s3 = inlined_call_operand.hbm [shape: f32[16,1,32], index: 3, kind: input, shape index: {}]   ;;  %s3732_s4 = inlined_call_operand.hbm [shape: f32[16,1,32], index: 4, kind: output, shape index: {}]  }
   0x1   :  { %3737 = sst [smem:[#allocation15_spill]] %s3728_s0 }
   0x2   :  { %3738 = sst [smem:[#allocation16_spill]] %s3729_s1 }
   0x3   :  { %9 = vsyncpa [#allocation3], 0 }
   0x4   :  { %11 = vsyncpa [#allocation3 + $0x1], 0 }
   0x5   :  { %12 = vsyncpa [#allocation6], 0 }
   0x6   :  { %14 = vsyncpa [#allocation6 + $0x1], 0 }
   0x7   :  { %15 = vsyncpa [#allocation9], 0 }
   0x8   :  { %17 = vsyncpa [#allocation9 + $0x1], 0 }
   0x9   :  { %18 = vsyncpa [#allocation4], 0 }
   0xa   :  { %20 = vsyncpa [#allocation4 + $0x1], 0  ;;  %s3194_s15 = smov 0   ;;  %s3196_s16 = smov 0  }
   0xb   :  { %s3198_s17 = smov 0   ;;  %s3200_s18 = smov 0  }
   0xc LB: > { %s3215_s19 = sadd.s32 4294967295, %s3153_s18   ;;  %s2480_s20 = sadd.s32 4294967294, %s3153_s18   ;;  %s3153_s18 = sphi %s3200_s18, %s3758_s18   ;;  %s3149_s17 = sphi %s3198_s17, %s3757_s17   ;;  %s3145_s16 = sphi %s3196_s16, %s3756_s16   ;;  %s3141_s15 = sphi %s3194_s15, %s3755_s15  }
   0xd   : > { %s3219_s21 = sadd.s32 1, %s3153_s18   ;;  %s33_s22 = sadd.s32 1, %s3149_s17 }
   0xe   : > { %s30_s23 = ssub.s32 %s3153_s18, %s3219_s21  ;;  %p40_p0 = scmp.ne.s32.totalorder %s3149_s17, %s3145_s16 }
   0xf   : > { %p31_p1 = scmp.eq.s32.totalorder %s30_s23, 0  ;;  %p41_p2 = scmp.eq.s32.totalorder %s3153_s18, 0 }
  0x10   : > { %p46_p3 = scmp.ne.s32.totalorder %s3145_s16, %s3141_s15  ;;  %p47_p4 = scmp.eq.s32.totalorder %s3215_s19, 0 }
  0x11   : > { %s3231_s24 = scalar_select %p31_p1, %s3149_s17, %s33_s22  }
  0x12   : > { %p42_p5 = por %p41_p2, %p40_p0  ;;  %p3233_p6 = por %p47_p4, %p46_p3 }
  0x13   : > { %p148_p7 = scmp.eq.s32.totalorder %s3215_s19, 1  ;;  %p154_p8 = scmp.eq.s32.totalorder %s2480_s20, 1 }
  0x14   : > { %s3739_s25 = scalar_select %p3233_p6, 1, 0 }
  0x15   : > { %p2868_p10 = scmp.lt.s32.totalorder %s3153_s18, 2  ;;  %p3240_p11 = por %p148_p7, %p40_p0 }
  0x16   : > { %p3244_p12 = por %p154_p8, %p46_p3  ;;  %s3249_s28 = sand.u32 1, %s3149_s17  }
  0x17   : > { %s3740_s26 = scalar_select %p3240_p11, 1, 0 }
  0x18   : > { %s3741_s27 = scalar_select %p3244_p12, 1, 0 }
  0x19   : > { %p3251_p13 = pnand %p2868_p10, %p42_p5  ;;  %s195_s30 = sand.u32 1, %s3153_s18  }
  0x1a   : > { %s2486_s5 = sshll.u32 %s3249_s28, 8  ;;  %s2549_s6 = sshll.u32 %s3153_s18, 12 }
  0x1b   : > { %s3743_s1 = sld [smem:[#allocation16_spill]]  ;;  %s199_s10 = scalar_lea.vmem [#allocation5], %s2486_s5 }
  0x1c   : > { %s207_s11 = sshll.u32 %s199_s10, 4  ;;  %s3266_s12 = scalar_lea.sflag [#allocation6], %s195_s30  ;;  %s3263_s11 = int_to_ptr.vmem [resolvable:$true] %s207_s11 }
  0x1d   : > { %p3272_p2 = pneg %p3251_p13 }
  0x21   : > { %s3261_s9 = scalar_lea.hbm %s3743_s1, %s2549_s6  ;;  %s2964_s23 = scalar_lea.hbm %s3743_s1, 8192 }
  0x22   : > { %s2959_s13 = scalar_lea.hbm %s3261_s9, 4096  ;;  %p2965_p5 = scmp.lt.u32.totalorder %s3261_s9, %s3743_s1 }
  0x23   : > { %p2960_p1 = scmp.ne.s32.totalorder %s3261_s9, %s2959_s13  ;;  %p2966_p7 = scmp.lt.u32.totalorder %s2964_s23, %s2959_s13 }
  0x24   : > { %p2968_p10 = scmp.lt.u32.totalorder %s2959_s13, %s3261_s9 }
  0x25   : > { %p2962_p3 = pnand %p3272_p2, %p2960_p1  ;;  %p2967_p8 = por %p2966_p7, %p2965_p5 }
  0x27   : > { %p2963_p4 = pneg %p2962_p3  ;;  %p2969_p9 = por %p2968_p10, %p2967_p8 }
  0x29   : > { %p2970_p0 = pnand %p2969_p9, %p2963_p4 }
  0x2b   : > { %2973 = shalt.err (!%p2970_p0)
}
  0x2c   : > { %s2974_s30 = scalar_lea.vmem %s3263_s11, 4096  ;;  %s3155_s7 = smov [#allocation5]  }
  0x2d   : > { %p2975_p1 = scmp.ne.s32.totalorder %s3263_s11, %s2974_s30  ;;  %s2979_s8 = sshll.u32 %s3155_s7, 4  ;;  %s2980_s8 = int_to_ptr.vmem [resolvable:$false] %s2979_s8 }
  0x2e   : > { %s2981_s10 = scalar_lea.vmem %s2980_s8, 8192  ;;  %p2982_p11 = scmp.lt.s32.totalorder %s3263_s11, %s2980_s8 }
  0x2f   : > { %p2977_p3 = pnand %p2975_p1, %p3272_p2  ;;  %p2983_p6 = scmp.lt.s32.totalorder %s2981_s10, %s2974_s30 }
  0x31   : > { %p2978_p12 = pneg %p2977_p3  ;;  %p2984_p5 = por %p2983_p6, %p2982_p11 }
  0x33   : > { %p2985_p7 = pnand %p2984_p5, %p2978_p12 }
  0x35   : > { %2988 = shalt.err (!%p2985_p7)
}
  0x36   : > { %s3735_s13 = smov 128   ;;  %s3736_s20 = smov 8  }
  0x37   : > { %2857 = dma.hbm_to_vmem [thread:$0]  (!%p3251_p13), %s3261_s9, 4096, %s3263_s11, %s3266_s12, %s3735_s13, %s3735_s13, %s3736_s20  }
  0x38   : > { %p257_p6 = scmp.lt.s32.totalorder %s3153_s18, 3  ;;  %s2483_s22 = sshll.u32 %s3249_s28, 6 }
  0x39   : > { %s2547_s23 = sshll.u32 %s3153_s18, 10  ;;  %p3745_p9 = scmp.ge.s32.totalorder %s3153_s18, 1 }
  0x3a   : > { %s3747_s0 = sld [smem:[#allocation15_spill]]  ;;  %s178_s8 = scalar_lea.vmem [#allocation2], %s2483_s22 }
  0x3b   : > { %p3304_p11 = pnand %p3745_p9, %p257_p6  ;;  %s185_s10 = sshll.u32 %s178_s8, 4  ;;  %s3313_s10 = int_to_ptr.vmem [resolvable:$true] %s185_s10 }
  0x3c   : > { %s2490_s9 = sshll.u32 %s3249_s28, 3  ;;  %s175_s11 = scalar_lea.sflag [#allocation3], %s3249_s28 }
  0x3d   : > { %s3746_s5 = scalar_select %p3304_p11, 1, 0 }
  0x40   : > { %s3311_s7 = scalar_lea.hbm %s3747_s0, %s2547_s23  ;;  %s2994_s23 = scalar_lea.hbm %s3747_s0, 2048 }
  0x41   : > { %s2989_s13 = scalar_lea.hbm %s3311_s7, 1024  ;;  %p2995_p8 = scmp.lt.u32.totalorder %s3311_s7, %s3747_s0 }
  0x42   : > { %p2990_p12 = scmp.ne.s32.totalorder %s3311_s7, %s2989_s13  ;;  %p2996_p10 = scmp.lt.u32.totalorder %s2994_s23, %s2989_s13 }
  0x43   : > { %p2998_p3 = scmp.lt.u32.totalorder %s2989_s13, %s3311_s7 }
  0x44   : > { %p2992_p0 = pnand %p2990_p12, %p3272_p2  ;;  %p2997_p1 = por %p2996_p10, %p2995_p8 }
  0x46   : > { %p2993_p4 = pneg %p2992_p0  ;;  %p2999_p5 = por %p2998_p3, %p2997_p1 }
  0x48   : > { %p3000_p7 = pnand %p2999_p5, %p2993_p4 }
  0x4a   : > { %3003 = shalt.err (!%p3000_p7)
}
  0x4b   : > { %s3004_s22 = scalar_lea.vmem %s3313_s10, 1024  ;;  %s3158_s1 = smov [#allocation2]  }
  0x4c   : > { %p3005_p6 = scmp.ne.s32.totalorder %s3313_s10, %s3004_s22  ;;  %s3009_s20 = sshll.u32 %s3158_s1, 4  ;;  %s3010_s20 = int_to_ptr.vmem [resolvable:$false] %s3009_s20 }
  0x4d   : > { %s3011_s8 = scalar_lea.vmem %s3010_s20, 2048  ;;  %p3012_p0 = scmp.lt.s32.totalorder %s3313_s10, %s3010_s20 }
  0x4e   : > { %p3007_p9 = pnand %p3005_p6, %p3272_p2  ;;  %p3013_p11 = scmp.lt.s32.totalorder %s3011_s8, %s3004_s22 }
  0x50   : > { %p3008_p12 = pneg %p3007_p9  ;;  %p3014_p8 = por %p3013_p11, %p3012_p0 }
  0x52   : > { %p3015_p10 = pnand %p3014_p8, %p3008_p12 }
  0x54   : > { %3018 = shalt.err (!%p3015_p10)
}
  0x55   : > { %s3748_s13 = smov 8   ;;  %s3749_s23 = smov 128  }
  0x56   : > { %2854 = dma.hbm_to_vmem [thread:$0]  (!%p3251_p13), %s3311_s7, 1024, %s3313_s10, %s175_s11, %s3749_s23, %s3749_s23, %s3748_s13  }
  0x57   : > { %s2550_s6 = sshll.u32 %s3153_s18, 7  ;;  %s221_s20 = scalar_lea.vmem [#allocation7], %s2490_s9 }
  0x58   : > { %s3349_s1 = scalar_lea.hbm %s3730_s2, %s2550_s6  ;;  %s228_s8 = sshll.u32 %s221_s20, 4  ;;  %s3353_s8 = int_to_ptr.vmem [resolvable:$true] %s228_s8 }
  0x59   : > { %s3019_s0 = scalar_lea.hbm %s3349_s1, 128  ;;  %s3024_s11 = scalar_lea.hbm %s3730_s2, 256 }
  0x5a   : > { %p3020_p11 = scmp.ne.s32.totalorder %s3349_s1, %s3019_s0  ;;  %p3025_p3 = scmp.lt.u32.totalorder %s3349_s1, %s3730_s2 }
  0x5b   : > { %p3026_p5 = scmp.lt.u32.totalorder %s3024_s11, %s3019_s0  ;;  %p3028_p6 = scmp.lt.u32.totalorder %s3019_s0, %s3349_s1 }
  0x5c   : > { %p3022_p4 = pnand %p3020_p11, %p3272_p2 }
  0x5d   : > { %p3027_p7 = por %p3026_p5, %p3025_p3 }
  0x5e   : > { %p3023_p1 = pneg %p3022_p4 }
  0x5f   : > { %p3029_p9 = por %p3028_p6, %p3027_p7 }
  0x61   : > { %p3030_p12 = pnand %p3029_p9, %p3023_p1 }
  0x63   : > { %3033 = shalt.err (!%p3030_p12)
}
  0x64   : > { %s3034_s30 = scalar_lea.vmem %s3353_s8, 128  ;;  %s3159_s22 = smov [#allocation7]  }
  0x65   : > { %p3035_p0 = scmp.ne.s32.totalorder %s3353_s8, %s3034_s30  ;;  %s3039_s20 = sshll.u32 %s3159_s22, 4  ;;  %s3040_s20 = int_to_ptr.vmem [resolvable:$false] %s3039_s20 }
  0x66   : > { %s3041_s7 = scalar_lea.vmem %s3040_s20, 256  ;;  %p3042_p11 = scmp.lt.s32.totalorder %s3353_s8, %s3040_s20 }
  0x67   : > { %p3037_p8 = pnand %p3035_p0, %p3272_p2  ;;  %p3043_p4 = scmp.lt.s32.totalorder %s3041_s7, %s3034_s30 }
  0x69   : > { %p3038_p10 = pneg %p3037_p8  ;;  %p3044_p3 = por %p3043_p4, %p3042_p11 }
  0x6b   : > { %p3045_p5 = pnand %p3044_p3, %p3038_p10 }
  0x6d   : > { %3048 = shalt.err (!%p3045_p5)
}
  0x6e   : > { %s3160_s0 = smov 16   ;;  %s3161_s10 = smov 1  }
  0x6f   : > { %2860 = dma.hbm_to_vmem [thread:$0]  (!%p3251_p13), %s3349_s1, 128, %s3353_s8, %s3266_s12, %s3160_s0, %s3160_s0, %s3161_s10  }
  0x70   : > { %s3385_s23 = scalar_lea.hbm %s3731_s3, %s2550_s6  ;;  %s242_s30 = scalar_lea.vmem [#allocation8], %s2490_s9 }
  0x71   : > { %s249_s22 = sshll.u32 %s242_s30, 4  ;;  %s239_s20 = scalar_lea.sflag [#allocation9], %s3249_s28  ;;  %s3389_s22 = int_to_ptr.vmem [resolvable:$true] %s249_s22 }
  0x72   : > { %s3049_s7 = scalar_lea.hbm %s3385_s23, 128  ;;  %s3054_s6 = scalar_lea.hbm %s3731_s3, 256 }
  0x73   : > { %p3050_p1 = scmp.ne.s32.totalorder %s3385_s23, %s3049_s7  ;;  %p3055_p9 = scmp.lt.u32.totalorder %s3385_s23, %s3731_s3 }
  0x74   : > { %p3056_p12 = scmp.lt.u32.totalorder %s3054_s6, %s3049_s7  ;;  %p3058_p8 = scmp.lt.u32.totalorder %s3049_s7, %s3385_s23 }
  0x75   : > { %p3052_p7 = pnand %p3050_p1, %p3272_p2 }
  0x76   : > { %p3057_p0 = por %p3056_p12, %p3055_p9 }
  0x77   : > { %p3053_p6 = pneg %p3052_p7 }
  0x78   : > { %p3059_p10 = por %p3058_p8, %p3057_p0 }
  0x7a   : > { %p3060_p11 = pnand %p3059_p10, %p3053_p6 }
  0x7c   : > { %3063 = shalt.err (!%p3060_p11)
}
  0x7d   : > { %s3064_s9 = scalar_lea.vmem %s3389_s22, 128  ;;  %s3162_s13 = smov [#allocation8]  }
  0x7e   : > { %p3065_p4 = scmp.ne.s32.totalorder %s3389_s22, %s3064_s9  ;;  %s3069_s30 = sshll.u32 %s3162_s13, 4  ;;  %s3070_s30 = int_to_ptr.vmem [resolvable:$false] %s3069_s30 }
  0x7f   : > { %s3071_s12 = scalar_lea.vmem %s3070_s30, 256  ;;  %p3072_p1 = scmp.lt.s32.totalorder %s3389_s22, %s3070_s30 }
  0x80   : > { %p3067_p3 = pnand %p3065_p4, %p3272_p2  ;;  %p3073_p7 = scmp.lt.s32.totalorder %s3071_s12, %s3064_s9 }
  0x82   : > { %p3068_p5 = pneg %p3067_p3  ;;  %p3074_p9 = por %p3073_p7, %p3072_p1 }
  0x84   : > { %p3075_p12 = pnand %p3074_p9, %p3068_p5 }
  0x86   : > { %3078 = shalt.err (!%p3075_p12)
}
  0x87   : > { %2863 = dma.hbm_to_vmem [thread:$0]  (!%p3251_p13), %s3385_s23, 128, %s3389_s22, %s239_s20, %s3160_s0, %s3160_s0, %s3161_s10  }
  0x88   : > { %p3750_p2 = scmp.ne.s32.totalorder %s3746_s5, 0 }
  0x89   : > { %s3421_s14 = sand.u32 (!%p3750_p2), 1, %s3145_s16   ;;  %p3751_p6 = scmp.ne.s32.totalorder (!%p3750_p2), %s3739_s25, 0 }
  0x8a   : > { %261 = sbr.rel (%p3750_p2) target bundleno = 1168 (0x490), region = 36  ;;  %s2497_s7 = sshll.u32 (!%p3750_p2), %s3421_s14, 6 }
  0x8b   : > { %s264_s1 = scalar_lea.sflag (!%p3750_p2), [#allocation3], %s3421_s14  ;;  %s3425_s29 = scalar_lea.vmem (!%p3750_p2), [#allocation2], %s2497_s7 }
  0x91   : > { %3124 = dma.done.wait (%p3751_p6), %s264_s1, 1024  }
  0x92   : > { %3126 = vsyncadd (%p3751_p6), %s264_s1, 4294966272  ;;  %s272_s28 = sand.u32 1, %s3215_s19   ;;  %s2498_s5 = sshll.u32 %s3421_s14, 8 }
  0x93   : > { %s273_s0 = scalar_lea.sflag [#allocation6], %s272_s28  ;;  %s3433_s10 = scalar_lea.vmem [#allocation5], %s2498_s5 }
  0x94   : > { %3128 = dma.done.wait (%p3751_p6), %s273_s0, 4224  }
  0x95   : > { %3130 = vsyncadd (%p3751_p6), %s273_s0, 4294963072  ;;  %s3440_s23 = sshll.u32 %s3421_s14, 3  ;;  %s291_s20 = scalar_lea.sflag [#allocation9], %s3421_s14 }
  0x96   : > { %s3443_s22 = scalar_lea.vmem [#allocation7], %s3440_s23  ;;  %s3447_s6 = scalar_lea.vmem [#allocation8], %s3440_s23 }
  0x97   : > { %3132 = dma.done.wait (%p3751_p6), %s291_s20, 128  }
  0x98   : > { %3134 = vsyncadd (%p3751_p6), %s291_s20, 4294967168  ;;  %v3163_v0 = vmov 0.0|0.0   ;;  %vm3164_vm0 = vmmov 0   ;;  %v3165_v1 = vmov 0.0   ;;  %v347_v2 = vld [vmem:[%s3433_s10] sm:$0xff]  ;;  %v348_v3 = vld [vmem:[%s3433_s10 + $0x8] sm:$0xff] }
  0x99   : > { %2793 = vmatprep.subr.bf16.mxu0 %v3163_v0  ;;  %2799 = vmatprep.subr.bf16.mxu1 %v3163_v0  ;;  %v351_v4 = vld [vmem:[%s3433_s10 + $0x20] sm:$0xff]  ;;  %v2794_v5 = vpack.c.bf16 %v348_v3, %v347_v2  ;;  %v352_v6 = vld [vmem:[%s3433_s10 + $0x28] sm:$0xff]  ;;  %v349_v7 = vld [vmem:[%s3433_s10 + $0x10] sm:$0xff]  ;;  %vm443_vm1 = vcmask 261120   ;;  %vm1644_vm2 = vcmask 57344   ;;  %vm1733_vm3 = vcmask 64512  }
  0x9a   : > { %2633 = vmatprep.mubr.msk.f32.mxu0 %vm3164_vm0, %v3165_v1  ;;  %2644 = vmatprep.mubr.msk.f32.mxu1 %vm3164_vm0, %v3165_v1  ;;  %v350_v8 = vld [vmem:[%s3433_s10 + $0x18] sm:$0xff]  ;;  %v2800_v9 = vpack.c.bf16 %v352_v6, %v351_v4  ;;  %v353_v10 = vld [vmem:[%s3433_s10 + $0x30] sm:$0xff]  ;;  %v355_v14 = vld [vmem:[%s3433_s10 + $0x40] sm:$0xff]  ;;  %vm2318_vm4 = vcmask 253952   ;;  %s333_s25 = scalar_lea.vmem [#allocation10], %s3440_s23  ;;  %s2552_s11 = sshll.u32 %s3215_s19, 7 }
  0x9b   : > { %v354_v11 = vld [vmem:[%s3433_s10 + $0x38] sm:$0xff]  ;;  %2795 = vmatpush3.bf16.msra.mxu0 %v2794_v5  ;;  %v2797_v12 = vpack.c.bf16 %v350_v8, %v349_v7  ;;  %v356_v15 = vld [vmem:[%s3433_s10 + $0x48] sm:$0xff]  ;;  %v359_v16 = vld [vmem:[%s3433_s10 + $0x60] sm:$0xff]  ;;  %s2341_s8 = sshll.u32 %s333_s25, 4  ;;  %s3682_s30 = scalar_lea.hbm %s3732_s4, %s2552_s11  ;;  %s3677_s8 = int_to_ptr.vmem [resolvable:$true] %s2341_s8 }
  0x9c   : > { %2801 = vmatpush3.bf16.msra.mxu1 %v2800_v9  ;;  %2796 = vmatprep.subr.bf16.mxu0 %v3163_v0  ;;  %v2803_v13 = vpack.c.bf16 %v354_v11, %v353_v10  ;;  %v360_v17 = vld [vmem:[%s3433_s10 + $0x68] sm:$0xff]  ;;  %v3474_v18 = vld [vmem:[%s3425_s29] sm:$0xff]  ;;  %v2806_v19 = vpack.c.bf16 %v356_v15, %v355_v14  ;;  %v357_v22 = vld [vmem:[%s3433_s10 + $0x50] sm:$0xff]  ;;  %s2328_s12 = scalar_lea.sflag [#allocation4], %s3421_s14  ;;  %s3079_s19 = scalar_lea.vmem %s3677_s8, 128 }
  0x9d   : > { %2802 = vmatprep.subr.bf16.mxu1 %v3163_v0  ;;  %v3477_v20 = vld [vmem:[%s3425_s29 + $0x8] sm:$0xff]  ;;  %v2812_v21 = vpack.c.bf16 %v360_v17, %v359_v16  ;;  %v358_v23 = vld [vmem:[%s3433_s10 + $0x58] sm:$0xff]  ;;  %v361_v24 = vld [vmem:[%s3433_s10 + $0x70] sm:$0xff]  ;;  %p3080_p13 = scmp.ne.s32.totalorder %s3677_s8, %s3079_s19  ;;  %p3752_p0 = scmp.ne.s32.totalorder %s3740_s26, 0 }
  0x9e   : > { %v362_v25 = vld [vmem:[%s3433_s10 + $0x78] sm:$0xff]  ;;  %v2809_v26 = vpack.c.bf16 %v358_v23, %v357_v22  ;;  %v363_v28 = vld [vmem:[%s3433_s10 + $0x80] sm:$0xff]  ;;  %v364_v29 = vld [vmem:[%s3433_s10 + $0x88] sm:$0xff]  ;;  %s3166_s7 = smov [#allocation10]  }
  0x9f   : > { %2798 = vmatpush3.bf16.msra.mxu0 %v2797_v12  ;;  %v2815_v27 = vpack.c.bf16 %v362_v25, %v361_v24  ;;  %v367_v30 = vld [vmem:[%s3433_s10 + $0xa0] sm:$0xff]  ;;  %v368_v31 = vld [vmem:[%s3433_s10 + $0xa8] sm:$0xff]  ;;  %v3500_v32 = vld [vmem:[%s3425_s29 + $0x10] sm:$0xff]  ;;  %v2818_v33 = vpack.c.bf16 %v364_v29, %v363_v28  ;;  %p3081_p8 = pnand %p3080_p13, %p3752_p0  ;;  %s3083_s1 = sshll.u32 %s3166_s7, 4  ;;  %s3084_s1 = int_to_ptr.vmem [resolvable:$false] %s3083_s1 }
  0xa0   : > { %2804 = vmatpush3.bf16.msra.mxu1 %v2803_v13  ;;  %2805 = vmatprep.subr.bf16.mxu0 %v3163_v0  ;;  %v3503_v34 = vld [vmem:[%s3425_s29 + $0x18] sm:$0xff]  ;;  %v2824_v35 = vpack.c.bf16 %v368_v31, %v367_v30  ;;  %v365_v36 = vld [vmem:[%s3433_s10 + $0x90] sm:$0xff]  ;;  %v371_v42 = vld [vmem:[%s3433_s10 + $0xc0] sm:$0xff]  ;;  %p3086_p11 = scmp.lt.s32.totalorder %s3677_s8, %s3084_s1 }
  0xa1   : > { %2811 = vmatprep.subr.bf16.mxu1 %v3163_v0  ;;  %v366_v37 = vld [vmem:[%s3433_s10 + $0x98] sm:$0xff]  ;;  %v369_v38 = vld [vmem:[%s3433_s10 + $0xb0] sm:$0xff]  ;;  %v372_v43 = vld [vmem:[%s3433_s10 + $0xc8] sm:$0xff]  ;;  %p3082_p10 = pneg %p3081_p8 }
  0xa2   : > { %2634 = vmatmul.mubr.msk.f32.vlgmr.msra.gmra.mrb[0].mxu0 %vm443_vm1, %v3474_v18  ;;  %v370_v39 = vld [vmem:[%s3433_s10 + $0xb8] sm:$0xff]  ;;  %v2821_v40 = vpack.c.bf16 %v366_v37, %v365_v36  ;;  %v375_v44 = vld [vmem:[%s3433_s10 + $0xe0] sm:$0xff]  ;;  %v376_v45 = vld [vmem:[%s3433_s10 + $0xe8] sm:$0xff]  ;;  %v2830_v47 = vpack.c.bf16 %v372_v43, %v371_v42 }
  0xa3   : > { %2645 = vmatmul.mubr.msk.f32.vlgmr.msra.gmra.mrb[0].mxu1 %vm443_vm1, %v3477_v20  ;;  %2807 = vmatpush3.bf16.msra.mxu0 %v2806_v19  ;;  %v2827_v41 = vpack.c.bf16 %v370_v39, %v369_v38  ;;  %v3526_v46 = vld [vmem:[%s3425_s29 + $0x20] sm:$0xff]  ;;  %v3529_v48 = vld [vmem:[%s3425_s29 + $0x28] sm:$0xff]  ;;  %v2836_v49 = vpack.c.bf16 %v376_v45, %v375_v44  ;;  %v373_v50 = vld [vmem:[%s3433_s10 + $0xd0] sm:$0xff] }
  0xa4   : > { %2813 = vmatpush3.bf16.msra.mxu1 %v2812_v21  ;;  %2808 = vmatprep.subr.bf16.mxu0 %v3163_v0  ;;  %v374_v51 = vld [vmem:[%s3433_s10 + $0xd8] sm:$0xff]  ;;  %v377_v52 = vld [vmem:[%s3433_s10 + $0xf0] sm:$0xff]  ;;  %v2502_v58 = vld [vmem:[%s3443_s22] ss:$0 sm:$0xff] }
  0xa5   : > { %2814 = vmatprep.subr.bf16.mxu1 %v3163_v0  ;;  %2655 = vmatprep.mubr.msk.f32.mxu0 %vm3164_vm0, %v3165_v1  ;;  %v378_v53 = vld [vmem:[%s3433_s10 + $0xf8] sm:$0xff]  ;;  %v2833_v54 = vpack.c.bf16 %v374_v51, %v373_v50  ;;  %v3548_v56 = vld [vmem:[%s3425_s29 + $0x30] sm:$0xff]  ;;  %v2503_v59 = vld [vmem:[%s3443_s22 + $0x1] ss:$0 sm:$0xff] }
  0xa6   : > { %2666 = vmatprep.mubr.msk.f32.mxu1 %vm3164_vm0, %v3165_v1  ;;  %v2839_v55 = vpack.c.bf16 %v378_v53, %v377_v52  ;;  %v3551_v57 = vld [vmem:[%s3425_s29 + $0x38] sm:$0xff]  ;;  %v2504_v3 = vld [vmem:[%s3443_s22 + $0x2] ss:$0 sm:$0xff]  ;;  %v2505_v4 = vld [vmem:[%s3443_s22 + $0x3] ss:$0 sm:$0xff]  ;;  %s3085_s29 = scalar_lea.vmem %s3084_s1, 256 }
  0xa7   : > { %2810 = vmatpush3.bf16.msra.mxu0 %v2809_v26  ;;  %v2506_v13 = vld [vmem:[%s3443_s22 + $0x4] ss:$0 sm:$0xff]  ;;  %v387_v14 = vld [vmem:[%s3447_s6] sm:$0x1]  ;;  %v2507_v15 = vld [vmem:[%s3443_s22 + $0x5] ss:$0 sm:$0xff]  ;;  %p3087_p4 = scmp.lt.s32.totalorder %s3085_s29, %s3079_s19 }
  0xa8   : > { %2816 = vmatpush3.bf16.msra.mxu1 %v2815_v27  ;;  %2817 = vmatprep.subr.bf16.mxu0 %v3163_v0  ;;  %v388_v16 = vld [vmem:[%s3447_s6 + $0x1] sm:$0x1]  ;;  %v2508_v27 = vld [vmem:[%s3443_s22 + $0x6] ss:$0 sm:$0xff]  ;;  %v389_v28 = vld [vmem:[%s3447_s6 + $0x2] sm:$0x1] }
  0xa9   : > { %2823 = vmatprep.subr.bf16.mxu1 %v3163_v0  ;;  %v2509_v29 = vld [vmem:[%s3443_s22 + $0x7] ss:$0 sm:$0xff]  ;;  %v390_v30 = vld [vmem:[%s3447_s6 + $0x3] sm:$0x1]  ;;  %v392_v42 = vld [vmem:[%s3447_s6 + $0x5] sm:$0x1]  ;;  %p3088_p3 = por %p3087_p4, %p3086_p11 }
  0xaa   : > { %2656 = vmatmul.mubr.msk.f32.vlgmr.msra.gmra.mrb[2].mxu0 %vm443_vm1, %v3500_v32  ;;  %v393_v45 = vld [vmem:[%s3447_s6 + $0x6] sm:$0x1] }
  0xab   : > { %2667 = vmatmul.mubr.msk.f32.vlgmr.msra.gmra.mrb[2].mxu1 %vm443_vm1, %v3503_v34  ;;  %2819 = vmatpush3.bf16.msra.mxu0 %v2818_v33  ;;  %p3089_p5 = pnand %p3088_p3, %p3082_p10 }
  0xac   : > { %2825 = vmatpush3.bf16.msra.mxu1 %v2824_v35  ;;  %2820 = vmatprep.subr.bf16.mxu0 %v3163_v0 }
  0xad   : > { %2826 = vmatprep.subr.bf16.mxu1 %v3163_v0  ;;  %2677 = vmatprep.mubr.msk.f32.mxu0 %vm3164_vm0, %v3165_v1 }
  0xae   : > { %2688 = vmatprep.mubr.msk.f32.mxu1 %vm3164_vm0, %v3165_v1 }
  0xaf   : > { %2822 = vmatpush3.bf16.msra.mxu0 %v2821_v40 }
  0xb0   : > { %2828 = vmatpush3.bf16.msra.mxu1 %v2827_v41  ;;  %2829 = vmatprep.subr.bf16.mxu0 %v3163_v0  ;;  %v391_v41 = vld [vmem:[%s3447_s6 + $0x4] sm:$0x1] }
  0xb1   : > { %2835 = vmatprep.subr.bf16.mxu1 %v3163_v0 }
  0xb2   : > { %2678 = vmatmul.mubr.msk.f32.vlgmr.msra.gmra.mrb[4].mxu0 %vm443_vm1, %v3526_v46 }
  0xb3   : > { %2689 = vmatmul.mubr.msk.f32.vlgmr.msra.gmra.mrb[4].mxu1 %vm443_vm1, %v3529_v48  ;;  %2831 = vmatpush3.bf16.msra.mxu0 %v2830_v47  ;;  %v394_v47 = vld [vmem:[%s3447_s6 + $0x7] sm:$0x1] }
  0xb4   : > { %2837 = vmatpush3.bf16.msra.mxu1 %v2836_v49  ;;  %2832 = vmatprep.subr.bf16.mxu0 %v3163_v0 }
  0xb5   : > { %2838 = vmatprep.subr.bf16.mxu1 %v3163_v0  ;;  %2699 = vmatprep.mubr.msk.f32.mxu0 %vm3164_vm0, %v3165_v1 }
  0xb6   : > { %2710 = vmatprep.mubr.msk.f32.mxu1 %vm3164_vm0, %v3165_v1 }
  0xb7   : > { %2834 = vmatpush3.bf16.msra.mxu0 %v2833_v54 }
  0xb8   : > { %2840 = vmatpush3.bf16.msra.mxu1 %v2839_v55  ;;  %2713 = vmatprep.subr.mxu0 %v3165_v1 }
  0xb9   : > { %2718 = vmatprep.subr.mxu1 %v3165_v1 }
  0xba   : > { %2700 = vmatmul.mubr.msk.f32.vlgmr.msra.gmra.mrb[6].mxu0 %vm443_vm1, %v3548_v56 }
  0xbb   : > { %2711 = vmatmul.mubr.msk.f32.vlgmr.msra.gmra.mrb[6].mxu1 %vm443_vm1, %v3551_v57  ;;  %2715 = vmatprep.mubr.msk.f32.mxu0 %vm3164_vm0, %v3165_v1 }
  0xbc   : > { %2720 = vmatprep.mubr.msk.f32.mxu1 %vm3164_vm0, %v3165_v1 }
 0x175   : > { %v513_v60 = vpop.f32.mrb[0].mxu0 }
 0x176   : > { %v514_v61 = vadd.f32 %v2502_v58, %v513_v60  ;;  %v586_v62 = vpop.f32.mrb[0].mxu1  ;;  %v2635_v63 = vpop.f32.mrb[1].mxu0 }
 0x177   : > { %v587_v0 = vadd.f32 %v2503_v59, %v586_v62  ;;  %v2646_v2 = vpop.f32.mrb[1].mxu1 }
 0x178   : > { %2911 = vtanh.f32 %v514_v61 }
 0x179   : > { %2913 = vtanh.f32 %v587_v0 }
 0x17d   : > { %v659_v5 = vpop.f32.mrb[2].mxu0 }
 0x17e   : > { %v660_v6 = vadd.f32 %v2504_v3, %v659_v5  ;;  %v732_v7 = vpop.f32.mrb[2].mxu1  ;;  %v2657_v8 = vpop.f32.mrb[3].mxu0 }
 0x17f   : > { %v733_v9 = vadd.f32 %v2505_v4, %v732_v7  ;;  %v2668_v10 = vpop.f32.mrb[3].mxu1 }
 0x180   : > { %2915 = vtanh.f32 %v660_v6 }
 0x181   : > { %2917 = vtanh.f32 %v733_v9 }
 0x182   : > { %v2912_v11 = vpop.eup %2911 }
 0x183   : > { %v2914_v12 = vpop.eup %2913  ;;  %2714 = vmatpush3.xpose.msk.msra.mxu0 %vm443_vm1, %v2912_v11 }
 0x184   : > { %2719 = vmatpush3.xpose.msk.msra.mxu1 %vm443_vm1, %v2914_v12  ;;  %2723 = vmatprep.subr.mxu0 %v3165_v1 }
 0x185   : > { %v805_v17 = vpop.f32.mrb[4].mxu0  ;;  %2728 = vmatprep.subr.mxu1 %v3165_v1 }
 0x186   : > { %v806_v19 = vadd.f32 %v2506_v13, %v805_v17  ;;  %v878_v21 = vpop.f32.mrb[4].mxu1  ;;  %v2679_v22 = vpop.f32.mrb[5].mxu0  ;;  %2716 = vmatmul.mubr.msk.f32.vlgmr.msra.gmra.mrb[8].mxu0 %vm443_vm1, %v387_v14 }
 0x187   : > { %v879_v23 = vadd.f32 %v2507_v15, %v878_v21  ;;  %v2690_v24 = vpop.f32.mrb[5].mxu1  ;;  %2721 = vmatmul.mubr.msk.f32.vlgmr.msra.gmra.mrb[8].mxu1 %vm443_vm1, %v388_v16  ;;  %2725 = vmatprep.mubr.msk.f32.mxu0 %vm3164_vm0, %v3165_v1 }
 0x188   : > { %2919 = vtanh.f32 %v806_v19  ;;  %2730 = vmatprep.mubr.msk.f32.mxu1 %vm3164_vm0, %v3165_v1 }
 0x189   : > { %2921 = vtanh.f32 %v879_v23 }
 0x18a   : > { %v2916_v25 = vpop.eup %2915 }
 0x18b   : > { %v2918_v26 = vpop.eup %2917  ;;  %2724 = vmatpush3.xpose.msk.msra.mxu0 %vm443_vm1, %v2916_v25 }
 0x18c   : > { %2729 = vmatpush3.xpose.msk.msra.mxu1 %vm443_vm1, %v2918_v26  ;;  %2733 = vmatprep.subr.mxu0 %v3165_v1 }
 0x18d   : > { %v951_v31 = vpop.f32.mrb[6].mxu0  ;;  %2738 = vmatprep.subr.mxu1 %v3165_v1 }
 0x18e   : > { %v952_v33 = vadd.f32 %v2508_v27, %v951_v31  ;;  %v1024_v35 = vpop.f32.mrb[6].mxu1  ;;  %v2701_v36 = vpop.f32.mrb[7].mxu0  ;;  %2726 = vmatmul.mubr.msk.f32.vlgmr.msra.gmra.mrb[10].mxu0 %vm443_vm1, %v389_v28 }
 0x18f   : > { %v1025_v37 = vadd.f32 %v2509_v29, %v1024_v35  ;;  %v2712_v38 = vpop.f32.mrb[7].mxu1  ;;  %2731 = vmatmul.mubr.msk.f32.vlgmr.msra.gmra.mrb[10].mxu1 %vm443_vm1, %v390_v30  ;;  %2735 = vmatprep.mubr.msk.f32.mxu0 %vm3164_vm0, %v3165_v1 }
 0x190   : > { %2923 = vtanh.f32 %v952_v33  ;;  %2740 = vmatprep.mubr.msk.f32.mxu1 %vm3164_vm0, %v3165_v1 }
 0x191   : > { %2925 = vtanh.f32 %v1025_v37 }
 0x192   : > { %v2920_v39 = vpop.eup %2919 }
 0x193   : > { %v2922_v40 = vpop.eup %2921  ;;  %2734 = vmatpush3.xpose.msk.msra.mxu0 %vm443_vm1, %v2920_v39 }
 0x194   : > { %2739 = vmatpush3.xpose.msk.msra.mxu1 %vm443_vm1, %v2922_v40  ;;  %2743 = vmatprep.subr.mxu0 %v3165_v1 }
 0x195   : > { %2748 = vmatprep.subr.mxu1 %v3165_v1 }
 0x196   : > { %2736 = vmatmul.mubr.msk.f32.vlgmr.msra.gmra.mrb[12].mxu0 %vm443_vm1, %v391_v41 }
 0x197   : > { %2741 = vmatmul.mubr.msk.f32.vlgmr.msra.gmra.mrb[12].mxu1 %vm443_vm1, %v392_v42  ;;  %2745 = vmatprep.mubr.msk.f32.mxu0 %vm3164_vm0, %v3165_v1 }
 0x198   : > { %2750 = vmatprep.mubr.msk.f32.mxu1 %vm3164_vm0, %v3165_v1 }
 0x19a   : > { %v2924_v43 = vpop.eup %2923 }
 0x19b   : > { %v2926_v44 = vpop.eup %2925  ;;  %2744 = vmatpush3.xpose.msk.msra.mxu0 %vm443_vm1, %v2924_v43 }
 0x19c   : > { %2749 = vmatpush3.xpose.msk.msra.mxu1 %vm443_vm1, %v2926_v44  ;;  %2753 = vmatprep.subr.mxu0 %v3165_v1 }
 0x19d   : > { %2758 = vmatprep.subr.mxu1 %v3165_v1 }
 0x19e   : > { %2746 = vmatmul.mubr.msk.f32.vlgmr.msra.gmra.mrb[14].mxu0 %vm443_vm1, %v393_v45 }
 0x19f   : > { %2751 = vmatmul.mubr.msk.f32.vlgmr.msra.gmra.mrb[14].mxu1 %vm443_vm1, %v394_v47  ;;  %2754 = vmatpush3.msra.mxu0 %v3474_v18 }
 0x1a0   : > { %2755 = vmatprep.mubr.msk.f32.mxu0 %vm3164_vm0, %v3165_v1  ;;  %2759 = vmatpush3.msra.mxu1 %v3477_v20 }
 0x1a1   : > { %2760 = vmatprep.mubr.msk.f32.mxu1 %vm3164_vm0, %v3165_v1  ;;  %2763 = vmatprep.subr.mxu0 %v3165_v1 }
 0x1a2   : > { %2768 = vmatprep.subr.mxu1 %v3165_v1 }
 0x259   : > { %v1108_v49 = vpop.f32.mrb[8].mxu0 }
 0x25a   : > { %v1645_v50 = vsel %vm1644_vm2, %v1108_v49, -inf  ;;  %v1184_v51 = vpop.f32.mrb[8].mxu1  ;;  %v2717_v52 = vpop.f32.mrb[9].mxu0 }
 0x25b   : > { %1646 = vmax.xlane.f32.xlu0 %v1645_v50  ;;  %v2722_v18 = vpop.f32.mrb[9].mxu1  ;;  %v1648_v53 = vsel %vm1644_vm2, %v1184_v51, -inf }
 0x25f   : > { %1649 = vmax.xlane.f32.xlu0 %v1648_v53 }
 0x261   : > { %v1260_v54 = vpop.f32.mrb[10].mxu0 }
 0x262   : > { %v1651_v20 = vsel %vm1644_vm2, %v1260_v54, -inf  ;;  %v1336_v55 = vpop.f32.mrb[10].mxu1  ;;  %v2727_v58 = vpop.f32.mrb[11].mxu0 }
 0x263   : > { %1652 = vmax.xlane.f32.xlu1 %v1651_v20  ;;  %v2732_v59 = vpop.f32.mrb[11].mxu1  ;;  %v1654_v60 = vsel %vm1644_vm2, %v1336_v55, -inf }
 0x267   : > { %1655 = vmax.xlane.f32.xlu1 %v1654_v60 }
 0x269   : > { %v1412_v61 = vpop.f32.mrb[12].mxu0 }
 0x26a   : > { %v1488_v62 = vpop.f32.mrb[12].mxu1  ;;  %v1657_v63 = vsel %vm1644_vm2, %v1412_v61, -inf  ;;  %v2737_v0 = vpop.f32.mrb[13].mxu0 }
 0x26b   : > { %v1660_v2 = vsel %vm1644_vm2, %v1488_v62, -inf  ;;  %1658 = vmax.xlane.f32.xlu0 %v1657_v63  ;;  %v2742_v3 = vpop.f32.mrb[13].mxu1 }
 0x26c   : > { %1661 = vmax.xlane.f32.xlu1 %v1660_v2 }
 0x271   : > { %v1564_v4 = vpop.f32.mrb[14].mxu0 }
 0x272   : > { %v1640_v5 = vpop.f32.mrb[14].mxu1  ;;  %v2747_v6 = vpop.f32.mrb[15].mxu0  ;;  %v1663_v7 = vsel %vm1644_vm2, %v1564_v4, -inf }
 0x273   : > { %v2752_v8 = vpop.f32.mrb[15].mxu1  ;;  %v1666_v9 = vsel %vm1644_vm2, %v1640_v5, -inf  ;;  %1664 = vmax.xlane.f32.xlu0 %v1663_v7 }
 0x274   : > { %1667 = vmax.xlane.f32.xlu1 %v1666_v9 }
 0x2e8   : > { %v1647_v10 = vpop.xlane.xlu0 %1646 }
 0x2e9   : > { %v1669_v11 = vsub.f32 %v1108_v49, %v1647_v10 }
 0x2eb   : > { %v1677_v12 = vmul.f32 1.442695, %v1669_v11 }
 0x2ec   : > { %v1650_v13 = vpop.xlane.xlu0 %1649 }
 0x2ed   : > { %2927 = vpow2.f32 %v1677_v12  ;;  %v1670_v14 = vsub.f32 %v1184_v51, %v1650_v13 }
 0x2ef   : > { %v1679_v15 = vmul.f32 1.442695, %v1670_v14 }
 0x2f0   : > { %v1653_v16 = vpop.xlane.xlu1 %1652 }
 0x2f1   : > { %2929 = vpow2.f32 %v1679_v15  ;;  %v1671_v17 = vsub.f32 %v1260_v54, %v1653_v16 }
 0x2f3   : > { %v1681_v19 = vmul.f32 1.442695, %v1671_v17 }
 0x2f4   : > { %v1656_v21 = vpop.xlane.xlu1 %1655 }
 0x2f5   : > { %2931 = vpow2.f32 %v1681_v19  ;;  %v1672_v22 = vsub.f32 %v1336_v55, %v1656_v21 }
 0x2f7   : > { %v2928_v23 = vpop.eup %2927  ;;  %v1683_v24 = vmul.f32 1.442695, %v1672_v22 }
 0x2f8   : > { %v1659_v25 = vpop.xlane.xlu0 %1658  ;;  %v1693_v26 = vsel %vm1644_vm2, %v2928_v23, 0.0 }
 0x2f9   : > { %2933 = vpow2.f32 %v1683_v24  ;;  %v1662_v27 = vpop.xlane.xlu1 %1661  ;;  %v1673_v28 = vsub.f32 %v1412_v61, %v1659_v25  ;;  %1694 = vadd.xlane.f32.xlu0 %v1693_v26 }
 0x2fa   : > { %v1674_v29 = vsub.f32 %v1488_v62, %v1662_v27 }
 0x2fb   : > { %v2930_v30 = vpop.eup %2929  ;;  %v1685_v31 = vmul.f32 1.442695, %v1673_v28 }
 0x2fc   : > { %v1687_v33 = vmul.f32 1.442695, %v1674_v29  ;;  %v1696_v35 = vsel %vm1644_vm2, %v2930_v30, 0.0 }
 0x2fd   : > { %2935 = vpow2.f32 %v1685_v31  ;;  %1697 = vadd.xlane.f32.xlu1 %v1696_v35 }
 0x2fe   : > { %2937 = vpow2.f32 %v1687_v33 }
 0x2ff   : > { %v2932_v36 = vpop.eup %2931 }
 0x300   : > { %v1665_v37 = vpop.xlane.xlu0 %1664  ;;  %v1699_v38 = vsel %vm1644_vm2, %v2932_v36, 0.0 }
 0x301   : > { %v1668_v39 = vpop.xlane.xlu1 %1667  ;;  %v1675_v40 = vsub.f32 %v1564_v4, %v1665_v37  ;;  %1700 = vadd.xlane.f32.xlu0 %v1699_v38 }
 0x302   : > { %v1676_v41 = vsub.f32 %v1640_v5, %v1668_v39 }
 0x303   : > { %v2934_v42 = vpop.eup %2933  ;;  %v1689_v43 = vmul.f32 1.442695, %v1675_v40 }
 0x304   : > { %v1691_v44 = vmul.f32 1.442695, %v1676_v41  ;;  %v1702_v45 = vsel %vm1644_vm2, %v2934_v42, 0.0 }
 0x305   : > { %2939 = vpow2.f32 %v1689_v43  ;;  %1703 = vadd.xlane.f32.xlu1 %v1702_v45 }
 0x306   : > { %2941 = vpow2.f32 %v1691_v44 }
 0x307   : > { %v2936_v47 = vpop.eup %2935 }
 0x308   : > { %v2938_v49 = vpop.eup %2937  ;;  %v1705_v50 = vsel %vm1644_vm2, %v2936_v47, 0.0 }
 0x309   : > { %v1708_v51 = vsel %vm1644_vm2, %v2938_v49, 0.0  ;;  %1706 = vadd.xlane.f32.xlu0 %v1705_v50 }
 0x30a   : > { %1709 = vadd.xlane.f32.xlu1 %v1708_v51 }
 0x30f   : > { %v2940_v52 = vpop.eup %2939 }
 0x310   : > { %v2942_v18 = vpop.eup %2941  ;;  %v1711_v53 = vsel %vm1644_vm2, %v2940_v52, 0.0 }
 0x311   : > { %v1714_v54 = vsel %vm1644_vm2, %v2942_v18, 0.0  ;;  %1712 = vadd.xlane.f32.xlu0 %v1711_v53 }
 0x312   : > { %1715 = vadd.xlane.f32.xlu1 %v1714_v54 }
 0x386   : > { %v1695_v20 = vpop.xlane.xlu0 %1694 }
 0x387   : > { %2943 = vrcp.f32 %v1695_v20 }
 0x38a   : > { %v1698_v55 = vpop.xlane.xlu1 %1697 }
 0x38b   : > { %2945 = vrcp.f32 %v1698_v55 }
 0x38e   : > { %v1701_v58 = vpop.xlane.xlu0 %1700 }
 0x38f   : > { %2947 = vrcp.f32 %v1701_v58 }
 0x391   : > { %v2944_v59 = vpop.eup %2943 }
 0x392   : > { %v1725_v60 = vmul.f32 %v2944_v59, %v2928_v23  ;;  %v1704_v61 = vpop.xlane.xlu1 %1703 }
 0x393   : > { %2949 = vrcp.f32 %v1704_v61 }
 0x394   : > { %2756 = vmatmul.mubr.msk.f32.vlgmr.msra.gmra.mrb[16].mxu0 %vm1733_vm3, %v1725_v60 }
 0x395   : > { %v2946_v62 = vpop.eup %2945  ;;  %2764 = vmatpush3.msra.mxu0 %v3500_v32  ;;  %2765 = vmatprep.mubr.msk.f32.mxu0 %vm3164_vm0, %v3165_v1 }
 0x396   : > { %v1726_v63 = vmul.f32 %v2946_v62, %v2930_v30  ;;  %v1707_v0 = vpop.xlane.xlu0 %1706  ;;  %2773 = vmatprep.subr.mxu0 %v3165_v1 }
 0x397   : > { %v1710_v2 = vpop.xlane.xlu1 %1709  ;;  %2951 = vrcp.f32 %v1707_v0 }
 0x398   : > { %2953 = vrcp.f32 %v1710_v2  ;;  %2761 = vmatmul.mubr.msk.f32.vlgmr.msra.gmra.mrb[16].mxu1 %vm1733_vm3, %v1726_v63 }
 0x399   : > { %v2948_v3 = vpop.eup %2947  ;;  %2769 = vmatpush3.msra.mxu1 %v3503_v34  ;;  %2770 = vmatprep.mubr.msk.f32.mxu1 %vm3164_vm0, %v3165_v1 }
 0x39a   : > { %v1727_v4 = vmul.f32 %v2948_v3, %v2932_v36  ;;  %2778 = vmatprep.subr.mxu1 %v3165_v1 }
 0x39c   : > { %2766 = vmatmul.mubr.msk.f32.vlgmr.msra.gmra.mrb[18].mxu0 %vm1733_vm3, %v1727_v4 }
 0x39d   : > { %v2950_v32 = vpop.eup %2949  ;;  %2774 = vmatpush3.msra.mxu0 %v3526_v46  ;;  %2775 = vmatprep.mubr.msk.f32.mxu0 %vm3164_vm0, %v3165_v1 }
 0x39e   : > { %v1728_v5 = vmul.f32 %v2950_v32, %v2934_v42  ;;  %v1713_v6 = vpop.xlane.xlu0 %1712  ;;  %2783 = vmatprep.subr.mxu0 %v3165_v1 }
 0x39f   : > { %v1716_v7 = vpop.xlane.xlu1 %1715  ;;  %2955 = vrcp.f32 %v1713_v6 }
 0x3a0   : > { %2957 = vrcp.f32 %v1716_v7  ;;  %2771 = vmatmul.mubr.msk.f32.vlgmr.msra.gmra.mrb[18].mxu1 %vm1733_vm3, %v1728_v5 }
 0x3a1   : > { %v2952_v34 = vpop.eup %2951  ;;  %2779 = vmatpush3.msra.mxu1 %v3529_v48  ;;  %2780 = vmatprep.mubr.msk.f32.mxu1 %vm3164_vm0, %v3165_v1 }
 0x3a2   : > { %v2954_v8 = vpop.eup %2953  ;;  %v1729_v46 = vmul.f32 %v2952_v34, %v2936_v47  ;;  %2788 = vmatprep.subr.mxu1 %v3165_v1 }
 0x3a3   : > { %v1730_v9 = vmul.f32 %v2954_v8, %v2938_v49 }
 0x3a4   : > { %2776 = vmatmul.mubr.msk.f32.vlgmr.msra.gmra.mrb[20].mxu0 %vm1733_vm3, %v1729_v46 }
 0x3a5   : > { %2781 = vmatmul.mubr.msk.f32.vlgmr.msra.gmra.mrb[20].mxu1 %vm1733_vm3, %v1730_v9  ;;  %2784 = vmatpush3.msra.mxu0 %v3548_v56 }
 0x3a6   : > { %2789 = vmatpush3.msra.mxu1 %v3551_v57  ;;  %2785 = vmatprep.mubr.msk.f32.mxu0 %vm3164_vm0, %v3165_v1 }
 0x3a7   : > { %2790 = vmatprep.mubr.msk.f32.mxu1 %vm3164_vm0, %v3165_v1 }
 0x3a9   : > { %v2956_v48 = vpop.eup %2955 }
 0x3aa   : > { %v2958_v10 = vpop.eup %2957  ;;  %v1731_v11 = vmul.f32 %v2956_v48, %v2940_v52 }
 0x3ab   : > { %v1732_v12 = vmul.f32 %v2958_v10, %v2942_v18 }
 0x3ac   : > { %2786 = vmatmul.mubr.msk.f32.vlgmr.msra.gmra.mrb[22].mxu0 %vm1733_vm3, %v1731_v11 }
 0x3ad   : > { %2791 = vmatmul.mubr.msk.f32.vlgmr.msra.gmra.mrb[22].mxu1 %vm1733_vm3, %v1732_v12 }
 0x467   : > { %v1803_v13 = vpop.f32.mrb[16].mxu0 }
 0x468   : > { %2319 = vst.msk [vmem:[%s333_s25] sm:$0x1] %vm2318_vm4, %v1803_v13  ;;  %v2757_v56 = vpop.f32.mrb[17].mxu0 }
 0x46b   : > { %v1876_v57 = vpop.f32.mrb[16].mxu1 }
 0x46c   : > { %2320 = vst.msk [vmem:[%s333_s25 + $0x1] sm:$0x1] %vm2318_vm4, %v1876_v57  ;;  %v2762_v14 = vpop.f32.mrb[17].mxu1 }
 0x46f   : > { %v1949_v1 = vpop.f32.mrb[18].mxu0 }
 0x470   : > { %2321 = vst.msk [vmem:[%s333_s25 + $0x2] sm:$0x1] %vm2318_vm4, %v1949_v1  ;;  %v2767_v15 = vpop.f32.mrb[19].mxu0 }
 0x473   : > { %v2022_v16 = vpop.f32.mrb[18].mxu1 }
 0x474   : > { %2322 = vst.msk [vmem:[%s333_s25 + $0x3] sm:$0x1] %vm2318_vm4, %v2022_v16  ;;  %v2772_v17 = vpop.f32.mrb[19].mxu1 }
 0x477   : > { %v2095_v19 = vpop.f32.mrb[20].mxu0 }
 0x478   : > { %2323 = vst.msk [vmem:[%s333_s25 + $0x4] sm:$0x1] %vm2318_vm4, %v2095_v19  ;;  %v2168_v21 = vpop.f32.mrb[20].mxu1  ;;  %v2777_v22 = vpop.f32.mrb[21].mxu0 }
 0x479   : > { %2324 = vst.msk [vmem:[%s333_s25 + $0x5] sm:$0x1] %vm2318_vm4, %v2168_v21  ;;  %v2782_v23 = vpop.f32.mrb[21].mxu1 }
 0x47f   : > { %v2241_v24 = vpop.f32.mrb[22].mxu0 }
 0x480   : > { %2325 = vst.msk [vmem:[%s333_s25 + $0x6] sm:$0x1] %vm2318_vm4, %v2241_v24  ;;  %v2314_v25 = vpop.f32.mrb[22].mxu1  ;;  %v2787_v26 = vpop.f32.mrb[23].mxu0 }
 0x481   : > { %2326 = vst.msk [vmem:[%s333_s25 + $0x7] sm:$0x1] %vm2318_vm4, %v2314_v25  ;;  %v2792_v27 = vpop.f32.mrb[23].mxu1 }
 0x482   : > { %3092 = shalt.err (!%p3089_p5)
}
 0x483   : > { %s3093_s28 = scalar_lea.hbm %s3682_s30, 128  ;;  %s3097_s10 = scalar_lea.hbm %s3732_s4, 256 }
 0x484   : > { %p3094_p1 = scmp.ne.s32.totalorder %s3682_s30, %s3093_s28  ;;  %p3098_p12 = scmp.lt.u32.totalorder %s3682_s30, %s3732_s4 }
 0x485   : > { %p3099_p2 = scmp.lt.u32.totalorder %s3097_s10, %s3093_s28  ;;  %p3101_p13 = scmp.lt.u32.totalorder %s3093_s28, %s3682_s30 }
 0x486   : > { %p3095_p7 = pnand %p3094_p1, %p3752_p0 }
 0x487   : > { %p3100_p6 = por %p3099_p2, %p3098_p12 }
 0x488   : > { %p3096_p9 = pneg %p3095_p7 }
 0x489   : > { %p3102_p8 = por %p3101_p13, %p3100_p6 }
 0x48b   : > { %p3103_p10 = pnand %p3102_p8, %p3096_p9 }
 0x48d   : > { %3106 = shalt.err (!%p3103_p10)
}
 0x48e   : > { %s3167_s20 = smov 16   ;;  %s3168_s6 = smov 1  }
 0x48f   : > { %2849 = dma.vmem_to_hbm [thread:$0]  (%p3752_p0), %s3677_s8, 128, %s3682_s30, %s2328_s12, %s3167_s20, %s3167_s20, %s3168_s6  }
 0x490 PF: > { %s2356_s25 = sand.u32 1, %s3141_s15   ;;  %p3753_p11 = scmp.ne.s32.totalorder %s3741_s27, 0 }
 0x491   : > { %p3754_p4 = scmp.ge.s32.totalorder %s3153_s18, 2  ;;  %s2357_s11 = scalar_lea.sflag [#allocation4], %s2356_s25 }
 0x493   : > { %p2865_p3 = pnand %p3754_p4, %p3753_p11 }
 0x495   : > { %3136 = dma.done.wait (!%p2865_p3), %s2357_s11, 128  }
 0x496   : > { %3138 = vsyncadd (!%p2865_p3), %s2357_s11, 4294967168  ;;  %p23_p5 = scmp.ge.s32.totalorder %s3219_s21, 4   ;;  %s3755_s15 = smov %s3145_s16 }
 0x497   : > { %s3756_s16 = smov %s3149_s17  ;;  %s3757_s17 = smov %s3231_s24 }
 0x498   : > { %s3758_s18 = smov %s3219_s21  ;;  %25 = sbr.rel (!%p23_p5) target bundleno = 12 (0xc), region = 118 }
 0x49f   :  { %2362 = vsyncpa [#allocation3], 1 }
 0x4a0   :  { %2364 = vsyncpa [#allocation3 + $0x1], 1 }
 0x4a1   :  { %2365 = vsyncpa [#allocation6], 1 }
 0x4a2   :  { %2367 = vsyncpa [#allocation6 + $0x1], 1 }
 0x4a3   :  { %2368 = vsyncpa [#allocation9], 1 }
 0x4a4   :  { %2370 = vsyncpa [#allocation9 + $0x1], 1 }
 0x4a5   :  { %2371 = vsyncpa [#allocation4], 1 }
 0x4a6   :  { %2373 = vsyncpa [#allocation4 + $0x1], 1 }

</bundles_post_ra>
